<compile_context>
chip_gen: v6e
topology: v6e:2x2x1
jax: 0.10.0
libtpu: 0.0.40
codegen_flags: <defaults>
</compile_context>

<pallas_src>
import functools
from typing import NamedTuple

import jax
import jax.numpy as jnp
from jax.experimental import pallas as pl
from jax.experimental.pallas import tpu as pltpu


def _round_up(x: int, m: int) -> int:
    return ((x + m - 1) // m) * m


def _vmem_capacity_bytes() -> int:
    """Per-TensorCore VMEM capacity; conservative (v7x, 64 MiB) fallback."""
    try:
        cap = int(getattr(pltpu.get_tpu_info(), "vmem_capacity_bytes", 0))
        if cap > 0:
            return cap
    except Exception:
        pass
    return 64 * 1024 * 1024


def _mlp_kernel(x_ref, w_ref, b_ref, o_ref, acc_ref, *, activation, relu):
    """One (tm, tn) output tile; grid axis 2 loops over K tiles (accumulation)."""
    k = pl.program_id(2)

    @pl.when(k == 0)
    def _init():
        acc_ref[...] = jnp.zeros_like(acc_ref)

    # x tile (tm, tk) @ w tile (tk, tn): native MXU operand layout,
    # f32 accumulation in the VMEM scratch.
    acc_ref[...] += jnp.dot(x_ref[...], w_ref[...],
                            preferred_element_type=jnp.float32)

    @pl.when(k == pl.num_programs(2) - 1)
    def _finalize():
        out = acc_ref[...] + b_ref[...]          # (1, tn) broadcasts over rows
        if activation:
            if relu:
                out = jnp.maximum(out, 0.0)
            else:
                # Numerically stable, exact sigmoid via a single EUP tanh:
                # sigmoid(x) = 0.5 * tanh(0.5 * x) + 0.5
                out = 0.5 * jnp.tanh(0.5 * out) + 0.5
        o_ref[...] = out.astype(o_ref.dtype)


class MLPParams(NamedTuple):
    w: jax.Array          # (Kp, Np) pre-transposed / padded / cast weight
    b: jax.Array          # (1, Np)  f32 padded bias
    in_features: int
    out_features: int
    tn: int
    tk: int


def prepare_mlp_params(weight, bias, *, compute_dtype=jnp.bfloat16,
                       tn=None, tk=None, max_tm=512):
    """One-time parameter preparation (model-load time, not per call).

    weight: (out_features, in_features)  -- PyTorch nn.Linear layout.
    bias:   (out_features,)
    compute_dtype: MXU input dtype (bf16 default; accumulation stays f32).
      Pass jnp.float32 (or None to keep the incoming dtype) for full precision.
    """
    Cout, Cin = weight.shape
    assert bias.shape == (Cout,)
    if compute_dtype is None:
        compute_dtype = weight.dtype
    itemsize = jnp.dtype(compute_dtype).itemsize
    out_itemsize = 4  # assume f32 outputs for budgeting (worst case)

    cap = _vmem_capacity_bytes()
    budget = int(cap * 0.70)

    tn_auto, tk_auto = tn is None, tk is None
    if tn is None:
        tn = min(512, _round_up(Cout, 128))
    if tk is None:
        tk = min(2048 if itemsize <= 2 else 1024, _round_up(Cin, 128))

    def footprint(tk_, tn_):
        return (2 * (max_tm * tk_ + tk_ * tn_) * itemsize   # double-buffered inputs
                + 2 * max_tm * tn_ * out_itemsize           # double-buffered output
                + max_tm * tn_ * 4)                          # f32 accumulator

    # Shrink K first (only adds accumulation steps), then N.
    while tk_auto and footprint(tk, tn) > budget and tk > 256:
        tk //= 2
    while tn_auto and footprint(tk, tn) > budget and tn > 128:
        tn //= 2

    Kp = _round_up(Cin, tk)
    Np = _round_up(Cout, tn)

    # One-time transpose to (Cin, Cout) + pad + cast: the kernel consumes a
    # native (tk, tn) RHS with plain jnp.dot, and the per-call forward path
    # never touches the weight again (no per-call pad HBM pass).
    w = weight.astype(compute_dtype).T
    if (Kp, Np) != (Cin, Cout):
        w = jnp.pad(w, ((0, Kp - Cin), (0, Np - Cout)))
    b = jnp.pad(bias.astype(jnp.float32), (0, Np - Cout)).reshape(1, Np)
    # TODO(synk): add an fp8 weight path (per-output-channel scales, dequant
    # folded into the finalize) for v7x inference — v7x MXU is fp8, not int8.
    return MLPParams(w=w, b=b, in_features=Cin, out_features=Cout, tn=tn, tk=tk)


def mlp_forward(x, params: MLPParams, *, activation=True, relu=True,
                tm=None, weight_buffers=2):
    """Pallas equivalent of MLP.forward for prepared params.

    x: (B, in_features). Returns (B, out_features) in x's original dtype.
    """
    B, Cin = x.shape
    assert Cin == params.in_features, "x last dim must equal in_features"
    Cout = params.out_features
    w, b = params.w, params.b
    Kp, Np = w.shape
    tn, tk = params.tn, params.tk
    out_dtype = x.dtype

    if x.dtype != w.dtype:
        x = x.astype(w.dtype)
    itemsize = jnp.dtype(w.dtype).itemsize
    out_itemsize = jnp.dtype(out_dtype).itemsize

    sub = 16 if itemsize == 2 else 8
    if tm is None:
        tm = min(512, _round_up(B, sub))
    Mp = _round_up(B, tm)
    if (Mp, Kp) != (B, Cin):
        x = jnp.pad(x, ((0, Mp - B), (0, Kp - Cin)))

    # v7x megacore: ensure at least one "parallel" grid axis has extent >= 2
    # so the grid can be sharded across both TensorCores.
    if Mp // tm == 1 and Np // tn == 1 and tn >= 256 and Np % (tn // 2) == 0:
        tn //= 2

    grid = (Mp // tm, Np // tn, Kp // tk)

    w_buffers = max(2, int(weight_buffers))
    if w_buffers > 2:
        # Deeper weight stream: hides exposed DMA on bandwidth-poor v5e.
        w_spec = pl.BlockSpec((tk, tn), lambda i, j, k: (k, j),
                              pipeline_mode=pl.Buffered(w_buffers))
    else:
        w_spec = pl.BlockSpec((tk, tn), lambda i, j, k: (k, j))

    # Per-step VMEM working set (incl. buffering) -> generation-aware limit.
    footprint = (2 * tm * tk * itemsize
                 + w_buffers * tk * tn * itemsize
                 + 2 * tm * tn * out_itemsize
                 + tm * tn * 4
                 + 2 * 2 * tn * 4)
    cap = _vmem_capacity_bytes()
    vmem_limit = int(min(cap * 3 // 4, max(32 * 1024 * 1024, 2 * footprint)))

    # HBM traffic including operand re-streaming across the M / N grid axes.
    n_m, n_n, _ = grid
    bytes_accessed = (Mp * Kp * itemsize * n_n        # x re-read per N tile
                      + Kp * Np * itemsize * n_m      # W re-read per M tile
                      + Np * 4 * n_m                  # bias
                      + Mp * Np * out_itemsize)       # output writeback
    flops = 2 * Mp * Kp * Np
    transcendentals = Mp * Np if (activation and not relu) else 0

    kernel = functools.partial(_mlp_kernel, activation=activation, relu=relu)

    out_padded = pl.pallas_call(
        kernel,
        out_shape=jax.ShapeDtypeStruct((Mp, Np), out_dtype),
        grid_spec=pltpu.PrefetchScalarGridSpec(
            num_scalar_prefetch=0,
            grid=grid,
            in_specs=[
                pl.BlockSpec((tm, tk), lambda i, j, k: (i, k)),   # x
                w_spec,                                            # W (Kp, Np)
                pl.BlockSpec((1, tn), lambda i, j, k: (0, j)),     # bias
            ],
            out_specs=pl.BlockSpec((tm, tn), lambda i, j, k: (i, j)),
            scratch_shapes=[pltpu.VMEM((tm, tn), jnp.float32)],
        ),
        compiler_params=pltpu.CompilerParams(
            dimension_semantics=("parallel", "parallel", "arbitrary"),
            vmem_limit_bytes=vmem_limit,
        ),
        cost_estimate=pl.CostEstimate(
            flops=flops,
            transcendentals=transcendentals,
            bytes_accessed=bytes_accessed,
        ),
    )(x, w, b)

    return out_padded[:B, :Cout]


def mlp_apply(x, weight, bias, *, activation=True, relu=True,
              compute_dtype=jnp.bfloat16, **kwargs):
    """Convenience one-shot wrapper (prepare + forward). Prefer preparing once."""
    params = prepare_mlp_params(weight, bias, compute_dtype=compute_dtype)
    return mlp_forward(x, params, activation=activation, relu=relu, **kwargs)


if __name__ == "__main__":
    key = jax.random.PRNGKey(0)
    k_x, k_w, k_b, k_x2, k_w2, k_b2 = jax.random.split(key, 6)

    # Small demo shapes consistent with the module (batch of feature vectors).
    batch, in_channels, out_channels = 8, 32, 16
    x = jax.random.normal(k_x, (batch, in_channels), dtype=jnp.float32)
    weight = jax.random.normal(
        k_w, (out_channels, in_channels), dtype=jnp.float32) * 0.1
    bias = jax.random.normal(k_b, (out_channels,), dtype=jnp.float32) * 0.1

    # Full-precision params for tight-tolerance checks.
    p_f32 = prepare_mlp_params(weight, bias, compute_dtype=jnp.float32)

    # Linear + ReLU (default MLP config).
    out_relu = jax.block_until_ready(
        mlp_forward(x, p_f32, activation=True, relu=True))
    ref_relu = jnp.maximum(x @ weight.T + bias, 0.0)
    assert out_relu.shape == (batch, out_channels)
    assert jnp.allclose(out_relu, ref_relu, atol=1e-4, rtol=1e-4)

    # Linear + Sigmoid (exact tanh formulation).
    out_sig = jax.block_until_ready(
        mlp_forward(x, p_f32, activation=True, relu=False))
    ref_sig = jax.nn.sigmoid(x @ weight.T + bias)
    assert jnp.allclose(out_sig, ref_sig, atol=1e-3, rtol=1e-3)

    # Linear only.
    out_lin = jax.block_until_ready(
        mlp_forward(x, p_f32, activation=False))
    ref_lin = x @ weight.T + bias
    assert jnp.allclose(out_lin, ref_lin, atol=1e-4, rtol=1e-4)

    # Default bf16 MXU inputs with f32 accumulation (v6e/v7x fast path).
    p_bf16 = prepare_mlp_params(weight, bias)   # compute_dtype=bf16 default
    out_bf16 = jax.block_until_ready(
        mlp_forward(x, p_bf16, activation=True, relu=True))
    assert out_bf16.shape == (batch, out_channels)
    assert out_bf16.dtype == x.dtype
    assert jnp.allclose(out_bf16, ref_relu, atol=5e-2, rtol=5e-2)

    # Multi-tile check: K accumulation (3 K tiles), N tiling (2 N tiles) and
    # zero padding on K/N — validates the pl.when init/finalize accumulator.
    B2, C2in, C2out = 24, 320, 192
    x2 = jax.random.normal(k_x2, (B2, C2in), dtype=jnp.float32)
    w2 = jax.random.normal(k_w2, (C2out, C2in), dtype=jnp.float32) * 0.05
    b2v = jax.random.normal(k_b2, (C2out,), dtype=jnp.float32) * 0.05
    p2 = prepare_mlp_params(w2, b2v, compute_dtype=jnp.float32, tn=128, tk=128)
    out2 = jax.block_until_ready(
        mlp_forward(x2, p2, activation=True, relu=True, tm=24))
    ref2 = jnp.maximum(x2 @ w2.T + b2v, 0.0)
    assert out2.shape == (B2, C2out)
    assert jnp.allclose(out2, ref2, atol=1e-3, rtol=1e-3)

    print("KERNEL_OK")
</pallas_src>

<mosaic_0001>
module attributes {stable_mosaic.version = 11 : i64} {
  func.func @_mlp_kernel(%arg0: i32, %arg1: i32, %arg2: i32, %arg3: memref<8x128xf32, #tpu.memory_space<vmem>>, %arg4: memref<128x128xf32, #tpu.memory_space<vmem>>, %arg5: memref<1x128xf32, #tpu.memory_space<vmem>>, %arg6: memref<8x128xf32, #tpu.memory_space<vmem>>, %arg7: memref<8x128xf32, #tpu.memory_space<vmem>>) attributes {dimension_semantics = [#tpu.dimension_semantics<parallel>, #tpu.dimension_semantics<parallel>, #tpu.dimension_semantics<arbitrary>], iteration_bounds = array<i64: 1, 1, 1>, scalar_prefetch = 0 : i64, scratch_operands = 1 : i64, tpu.core_type = #tpu.core_type<tc>, window_params = [{transform_indices = @transform_0, window_bounds = array<i64: 8, 128>}, {transform_indices = @transform_1, window_bounds = array<i64: 128, 128>}, {transform_indices = @transform_2, window_bounds = array<i64: 1, 128>}, {transform_indices = @transform_3, window_bounds = array<i64: 8, 128>}]} {
    %c0_i32 = arith.constant 0 : i32
    %0 = arith.cmpi eq, %arg2, %c0_i32 : i32
    %1 = arith.extui %0 : i1 to i32
    %c0_i32_0 = arith.constant 0 : i32
    %2 = arith.cmpi ne, %1, %c0_i32_0 : i32
    scf.if %2 {
      %cst_10 = arith.constant 0.000000e+00 : f32
      %12 = vector.broadcast %cst_10 : f32 to vector<8x128xf32>
      %c0_11 = arith.constant 0 : index
      %c0_12 = arith.constant 0 : index
      %13 = vector.load %arg7[%c0_11, %c0_12] : memref<8x128xf32, #tpu.memory_space<vmem>>, vector<8x128xf32>
      tpu.vector_store %arg7[%c0_11, %c0_12], %12 {strides = array<i32>} : memref<8x128xf32, #tpu.memory_space<vmem>>, vector<8x128xf32>,
    } else {
    }
    %c0 = arith.constant 0 : index
    %c0_1 = arith.constant 0 : index
    %3 = vector.load %arg7[%c0, %c0_1] : memref<8x128xf32, #tpu.memory_space<vmem>>, vector<8x128xf32>
    %c0_2 = arith.constant 0 : index
    %c0_3 = arith.constant 0 : index
    %4 = vector.load %arg3[%c0_2, %c0_3] : memref<8x128xf32, #tpu.memory_space<vmem>>, vector<8x128xf32>
    %c0_4 = arith.constant 0 : index
    %c0_5 = arith.constant 0 : index
    %5 = vector.load %arg4[%c0_4, %c0_5] : memref<128x128xf32, #tpu.memory_space<vmem>>, vector<128x128xf32>
    %cst = arith.constant dense<0.000000e+00> : vector<8x128xf32>
    %6 = tpu.matmul %4, %5, %cst {dimension_numbers = #tpu.dot_dimension_numbers<[1], [0], [0], [1], [0, 0, 1, 1], [], []>} : vector<8x128xf32>, vector<128x128xf32>, vector<8x128xf32> -> vector<8x128xf32>
    %7 = arith.addf %3, %6 : vector<8x128xf32>
    %c0_6 = arith.constant 0 : index
    %c0_7 = arith.constant 0 : index
    %8 = vector.load %arg7[%c0_6, %c0_7] : memref<8x128xf32, #tpu.memory_space<vmem>>, vector<8x128xf32>
    tpu.vector_store %arg7[%c0_6, %c0_7], %7 {strides = array<i32>} : memref<8x128xf32, #tpu.memory_space<vmem>>, vector<8x128xf32>,
    %c0_i32_8 = arith.constant 0 : i32
    %9 = arith.cmpi eq, %arg2, %c0_i32_8 : i32
    %10 = arith.extui %9 : i1 to i32
    %c0_i32_9 = arith.constant 0 : i32
    %11 = arith.cmpi ne, %10, %c0_i32_9 : i32
    scf.if %11 {
      %c0_10 = arith.constant 0 : index
      %c0_11 = arith.constant 0 : index
      %12 = vector.load %arg7[%c0_10, %c0_11] : memref<8x128xf32, #tpu.memory_space<vmem>>, vector<8x128xf32>
      %c0_12 = arith.constant 0 : index
      %c0_13 = arith.constant 0 : index
      %13 = vector.load %arg5[%c0_12, %c0_13] : memref<1x128xf32, #tpu.memory_space<vmem>>, vector<1x128xf32>
      %14 = vector.broadcast %13 : vector<1x128xf32> to vector<8x128xf32>
      %15 = arith.addf %12, %14 : vector<8x128xf32>
      %cst_14 = arith.constant 0.000000e+00 : f32
      %16 = vector.broadcast %cst_14 : f32 to vector<8x128xf32>
      %17 = arith.maximumf %15, %16 : vector<8x128xf32>
      %c0_15 = arith.constant 0 : index
      %c0_16 = arith.constant 0 : index
      %18 = vector.load %arg6[%c0_15, %c0_16] : memref<8x128xf32, #tpu.memory_space<vmem>>, vector<8x128xf32>
      tpu.vector_store %arg6[%c0_15, %c0_16], %17 {strides = array<i32>} : memref<8x128xf32, #tpu.memory_space<vmem>>, vector<8x128xf32>,
    } else {
    }
    return
  }
  func.func @transform_0(%arg0: i32, %arg1: i32, %arg2: i32) -> (i32, i32) {
    %c0_i32 = arith.constant 0 : i32
    return %arg0, %arg2 : i32, i32
  }
  func.func @transform_1(%arg0: i32, %arg1: i32, %arg2: i32) -> (i32, i32) {
    %c0_i32 = arith.constant 0 : i32
    return %arg2, %arg1 : i32, i32
  }
  func.func @transform_2(%arg0: i32, %arg1: i32, %arg2: i32) -> (i32, i32) {
    %c0_i32 = arith.constant 0 : i32
    %c0_i32_0 = arith.constant 0 : i32
    return %c0_i32, %arg1 : i32, i32
  }
  func.func @transform_3(%arg0: i32, %arg1: i32, %arg2: i32) -> (i32, i32) {
    %c0_i32 = arith.constant 0 : i32
    return %arg0, %arg1 : i32, i32
  }
}

</mosaic_0001>

<bundles_post_ra>
// kernel: tpu_custom_call.1
= control target key start
LH: loop header
LB: loop body
LE: loop exit
PB: predicated region body
PF: predicated region fallthrough
CT: control target
= control target key end

     0   :  { %8 = vsyncpa [#allocation4], 0  ;;  %s331_s0 = inlined_call_operand.hbm [shape: f32[8,128], index: 0, kind: input, shape index: {}]   ;;  %s332_s1 = inlined_call_operand.hbm [shape: f32[128,128], index: 1, kind: input, shape index: {}]   ;;  %s333_s2 = inlined_call_operand.vmem [shape: f32[1,128], index: 2, kind: input, shape index: {}]   ;;  %s334_s3 = inlined_call_operand.hbm [shape: f32[8,128], index: 3, kind: output, shape index: {}]  }
   0x1   :  { %9 = vsyncpa [#allocation7], 0 }
   0x2   :  { %10 = vsyncpa [#allocation5], 0  ;;  %s292_s12 = smov [#allocation3]   ;;  %s293_s14 = smov [#allocation6]  }
   0x3   :  { %s17_s13 = sshll.u32 %s292_s12, 4  ;;  %s26_s15 = sshll.u32 %s293_s14, 4  ;;  %s18_s13 = int_to_ptr.vmem [resolvable:$true] %s17_s13  ;;  %s27_s15 = int_to_ptr.vmem [resolvable:$true] %s26_s15 }
   0x4   :  { %s234_s16 = scalar_lea.vmem %s18_s13, 128  ;;  %p239_p1 = scmp.lt.s32.totalorder %s18_s13, %s18_s13 }
   0x5   :  { %p235_p0 = scmp.ne.s32.totalorder %s18_s13, %s234_s16  ;;  %p240_p2 = scmp.lt.s32.totalorder %s234_s16, %s234_s16 }
   0x7   :  { %p241_p3 = por %p240_p2, %p239_p1 }
   0x9   :  { %p242_p4 = pnand %p241_p3, %p235_p0 }
   0xb   :  { %245 = shalt.err (!%p242_p4)
}
   0xc   :  { %20 = dma.hbm_to_vmem [thread:$0]  %s331_s0, 128, %s18_s13, [#allocation4]  }
   0xd   :  { %s254_s19 = scalar_lea.vmem %s27_s15, 2048  ;;  %p259_p6 = scmp.lt.s32.totalorder %s27_s15, %s27_s15 }
   0xe   :  { %p255_p5 = scmp.ne.s32.totalorder %s27_s15, %s254_s19  ;;  %p260_p7 = scmp.lt.s32.totalorder %s254_s19, %s254_s19 }
  0x10   :  { %p261_p8 = por %p260_p7, %p259_p6 }
  0x12   :  { %p262_p9 = pnand %p261_p8, %p255_p5 }
  0x14   :  { %265 = shalt.err (!%p262_p9)
}
  0x15   :  { %s294_s20 = smov 128   ;;  %s295_s21 = smov 8  }
  0x16   :  { %32 = dma.hbm_to_vmem [thread:$0]  %s332_s1, 2048, %s27_s15, [#allocation7], %s294_s20, %s294_s20, %s295_s21  }
  0x17   :  { %286 = dma.done.wait [#allocation4], 128  }
  0x18   :  { %287 = vsyncadd [#allocation4], 4294967168 }
  0x19   :  { %288 = dma.done.wait [#allocation7], 2048  }
  0x1a   :  { %289 = vsyncadd [#allocation7], 4294965248  ;;  %v296_v0 = vmov 0.0   ;;  %vm297_vm0 = vmmov 0   ;;  %v63_v1 = vld [vmem:[#allocation6 + $0x78] sm:$0xff]  ;;  %v62_v2 = vld [vmem:[#allocation6 + $0x70] sm:$0xff] }
  0x1b   :  { %184 = vmatprep.subr.mxu0 %v296_v0  ;;  %216 = vmatprep.mubr.msk.f32.mxu0 %vm297_vm0, %v296_v0  ;;  %v61_v3 = vld [vmem:[#allocation6 + $0x68] sm:$0xff]  ;;  %v60_v4 = vld [vmem:[#allocation6 + $0x60] sm:$0xff]  ;;  %v59_v5 = vld [vmem:[#allocation6 + $0x58] sm:$0xff]  ;;  %s298_s24 = smov [#allocation8]  }
  0x1c   :  { %185 = vmatpush3.msra.mxu0 %v63_v1  ;;  %v58_v6 = vld [vmem:[#allocation6 + $0x50] sm:$0xff]  ;;  %v57_v7 = vld [vmem:[#allocation6 + $0x48] sm:$0xff]  ;;  %v56_v8 = vld [vmem:[#allocation6 + $0x40] sm:$0xff]  ;;  %s156_s25 = sshll.u32 %s298_s24, 4  ;;  %s157_s25 = int_to_ptr.vmem [resolvable:$true] %s156_s25 }
  0x1d   :  { %186 = vmatprep.subr.mxu0 %v296_v0  ;;  %v55_v9 = vld [vmem:[#allocation6 + $0x38] sm:$0xff]  ;;  %v54_v10 = vld [vmem:[#allocation6 + $0x30] sm:$0xff]  ;;  %v53_v11 = vld [vmem:[#allocation6 + $0x28] sm:$0xff]  ;;  %s266_s26 = scalar_lea.vmem %s157_s25, 128  ;;  %p271_p11 = scmp.lt.s32.totalorder %s157_s25, %s157_s25 }
  0x1e   :  { %187 = vmatpush3.msra.mxu0 %v62_v2  ;;  %v52_v12 = vld [vmem:[#allocation6 + $0x20] sm:$0xff]  ;;  %v51_v13 = vld [vmem:[#allocation6 + $0x18] sm:$0xff]  ;;  %v50_v14 = vld [vmem:[#allocation6 + $0x10] sm:$0xff]  ;;  %p267_p10 = scmp.ne.s32.totalorder %s157_s25, %s266_s26  ;;  %p272_p12 = scmp.lt.s32.totalorder %s266_s26, %s266_s26 }
  0x1f   :  { %188 = vmatprep.subr.mxu0 %v296_v0  ;;  %v49_v15 = vld [vmem:[#allocation6 + $0x8] sm:$0xff]  ;;  %v48_v16 = vld [vmem:[#allocation6] sm:$0xff]  ;;  %v47_v17 = vld [vmem:[#allocation3] sm:$0xff] }
  0x20   :  { %189 = vmatpush3.msra.mxu0 %v61_v3  ;;  %v166_v18 = vld [vmem:[%s333_s2] ss:$0 sm:$0xff]  ;;  %p273_p13 = por %p272_p12, %p271_p11 }
  0x21   :  { %190 = vmatprep.subr.mxu0 %v296_v0 }
  0x22   :  { %191 = vmatpush3.msra.mxu0 %v60_v4  ;;  %p274_p0 = pnand %p273_p13, %p267_p10 }
  0x23   :  { %192 = vmatprep.subr.mxu0 %v296_v0 }
  0x24   :  { %193 = vmatpush3.msra.mxu0 %v59_v5 }
  0x25   :  { %194 = vmatprep.subr.mxu0 %v296_v0 }
  0x26   :  { %195 = vmatpush3.msra.mxu0 %v58_v6 }
  0x27   :  { %196 = vmatprep.subr.mxu0 %v296_v0 }
  0x28   :  { %197 = vmatpush3.msra.mxu0 %v57_v7 }
  0x29   :  { %198 = vmatprep.subr.mxu0 %v296_v0 }
  0x2a   :  { %199 = vmatpush3.msra.mxu0 %v56_v8 }
  0x2b   :  { %200 = vmatprep.subr.mxu0 %v296_v0 }
  0x2c   :  { %201 = vmatpush3.msra.mxu0 %v55_v9 }
  0x2d   :  { %202 = vmatprep.subr.mxu0 %v296_v0 }
  0x2e   :  { %203 = vmatpush3.msra.mxu0 %v54_v10 }
  0x2f   :  { %204 = vmatprep.subr.mxu0 %v296_v0 }
  0x30   :  { %205 = vmatpush3.msra.mxu0 %v53_v11 }
  0x31   :  { %206 = vmatprep.subr.mxu0 %v296_v0 }
  0x32   :  { %207 = vmatpush3.msra.mxu0 %v52_v12 }
  0x33   :  { %208 = vmatprep.subr.mxu0 %v296_v0 }
  0x34   :  { %209 = vmatpush3.msra.mxu0 %v51_v13 }
  0x35   :  { %210 = vmatprep.subr.mxu0 %v296_v0 }
  0x36   :  { %211 = vmatpush3.msra.mxu0 %v50_v14 }
  0x37   :  { %212 = vmatprep.subr.mxu0 %v296_v0 }
  0x38   :  { %213 = vmatpush3.msra.mxu0 %v49_v15 }
  0x39   :  { %214 = vmatprep.subr.mxu0 %v296_v0 }
  0x3a   :  { %215 = vmatpush3.msra.mxu0 %v48_v16 }
  0x3b   :  { %217 = vmatmul.mubr.f32.vlgmr.msra.gmra.mxu0 %v47_v17 }
  0xfb   :  { %v130_v19 = vpop.f32.mrf.mxu0 }
  0xfc   :  { %v147_v20 = vadd.f32 %v166_v18, %v130_v19 }
  0xfd   :  { %v218_v21 = vpop.f32.mrf.mxu0 }
  0xfe   :  { %v148_v22 = vmax.f32 %v147_v20, 0.0 }
 0x100   :  { %149 = vst [vmem:[#allocation8] sm:$0xff] %v148_v22 }
 0x101   :  { %277 = shalt.err (!%p274_p0)
}
 0x102   :  { %159 = dma.vmem_to_hbm [thread:$0]  %s157_s25, 128, %s334_s3, [#allocation5]  }
 0x103   :  { %290 = dma.done.wait [#allocation5], 128  }
 0x104   :  { %291 = vsyncadd [#allocation5], 4294967168 }
 0x105   :  { %163 = vsyncpa [#allocation4], 1 }
 0x106   :  { %164 = vsyncpa [#allocation7], 1 }
 0x107   :  { %165 = vsyncpa [#allocation5], 1 }

</bundles_post_ra>
